<compile_context>
chip_gen: v7x
topology: tpu7x:2x2x1
jax: 0.10.0
libtpu: 0.0.40
codegen_flags: <defaults>
</compile_context>

<pallas_src>
import functools

import jax
import jax.numpy as jnp
from jax.experimental import pallas as pl
from jax.experimental.pallas import tpu as pltpu

_NEG_LARGE = -1e30  # padded-class bias: exp(-1e30 - m) underflows to exactly 0 in f32


def _round_up(x, m):
    return ((x + m - 1) // m) * m


def _mlp_softmax_kernel(x_ref, w1_ref, b1_ref, w2_ref, b2_ref,
                        w3_ref, b3_ref, w4_ref, b4_ref, o_ref,
                        *, compute_dtype, approx_recip):
    cd = compute_dtype

    # Layer 1: Linear(input_dim, 128) + ReLU   (Dropout = identity at eval)
    x = x_ref[...].astype(cd)
    h = jnp.dot(x, w1_ref[...], preferred_element_type=jnp.float32) + b1_ref[...]
    h = jnp.maximum(h, 0.0)

    # Layer 2: Linear(128, 64) + ReLU          (Dropout = identity at eval)
    h = jnp.dot(h.astype(cd), w2_ref[...], preferred_element_type=jnp.float32) + b2_ref[...]
    h = jnp.maximum(h, 0.0)

    # Layer 3: Linear(64, 32) + ReLU
    h = jnp.dot(h.astype(cd), w3_ref[...], preferred_element_type=jnp.float32) + b3_ref[...]
    h = jnp.maximum(h, 0.0)

    # Layer 4: Linear(32, C_pad). Padded classes have zero weights and -1e30 bias,
    # so they contribute exactly 0 to the softmax numerator/denominator.
    logits = jnp.dot(h.astype(cd), w4_ref[...], preferred_element_type=jnp.float32) + b4_ref[...]

    # Numerically-stable softmax over dim=1 (row-wise only; safe for the masked
    # ragged last block). Divide goes to the EUP via pl.reciprocal.
    m = jnp.max(logits, axis=1, keepdims=True)
    e = jnp.exp(logits - m)
    s = jnp.sum(e, axis=1, keepdims=True)
    o_ref[...] = (e * pl.reciprocal(s, approx=approx_recip)).astype(o_ref.dtype)


def my_clf_forward(x, params, *, tile_b=1024, compute_dtype=jnp.bfloat16,
                   out_dtype=jnp.float32):
    """Forward pass of My_Clf (eval mode).

    x: [B, input_dim], f32 or bf16 (passed through to the kernel in its own dtype —
       do NOT pre-cast in the wrapper, that's an extra HBM pass).
    params: dict of f32 weights [in,out] and biases [1,out] (see init_params).
    tile_b: requested batch tile. Auto-shrunk to (a) the batch size, (b) keep >=2 grid
       steps when B >= 256 (v7x megacore), (c) a 48 MiB VMEM budget (v7x-safe).
    compute_dtype: matmul operand dtype (bf16 recommended on all generations);
       accumulation, bias-add, ReLU and softmax stay f32.
    out_dtype: dtype of the stored probabilities (f32 matches PyTorch; bf16 halves the
       dominant padded-output HBM writeback).
    """
    B, input_dim = x.shape
    h1 = params["w1"].shape[1]
    h2 = params["w2"].shape[1]
    h3 = params["w3"].shape[1]
    num_classes = params["w4"].shape[1]

    cd = jnp.dtype(compute_dtype)
    od = jnp.dtype(out_dtype)

    # Lane-dense output: pad the class dim up to a multiple of 128.
    c_pad = _round_up(max(num_classes, 128), 128)

    # ---------------- batch-tile selection & VMEM budgeting ----------------
    w_elems = input_dim * h1 + h1 * h2 + h2 * h3 + h3 * c_pad
    b_elems = h1 + h2 + h3 + c_pad
    w_bytes = w_elems * cd.itemsize + b_elems * 4

    tile_b = max(8, _round_up(tile_b, 8))
    tile_b = min(tile_b, _round_up(B, 8))            # never bigger than the batch
    if B >= 256:
        # keep >= 2 grid steps so both v7x TensorCores get a share of the batch axis
        tile_b = min(tile_b, _round_up(pl.cdiv(B, 2), 128))

    def _vmem_need(t):
        # double-buffered x tile + out tile, plus double-buffered weights/biases
        return 2 * t * (input_dim * x.dtype.itemsize + c_pad * od.itemsize) + 2 * w_bytes

    vmem_budget = 48 * 1024 * 1024                   # safe under v7x's 64 MiB physical VMEM
    while _vmem_need(tile_b) > vmem_budget and tile_b > 128:
        tile_b = max(128, _round_up(tile_b // 2, 8))

    vmem_limit = int(min(100 * 1024 * 1024,
                         max(32 * 1024 * 1024, _vmem_need(tile_b) + (8 << 20))))

    grid = pl.cdiv(B, tile_b)                        # no wrapper-side batch padding

    # ---------------- parameter packing (class-dim pad only) ----------------
    w1 = params["w1"].astype(cd)
    w2 = params["w2"].astype(cd)
    w3 = params["w3"].astype(cd)
    w4 = jnp.pad(params["w4"].astype(cd), ((0, 0), (0, c_pad - num_classes)))
    b1 = params["b1"].astype(jnp.float32)
    b2 = params["b2"].astype(jnp.float32)
    b3 = params["b3"].astype(jnp.float32)
    b4 = jnp.pad(params["b4"].astype(jnp.float32),
                 ((0, 0), (0, c_pad - num_classes)),
                 constant_values=_NEG_LARGE)

    # Advisory cost estimate for XLA scheduling around the custom call.
    n_rows = grid * tile_b
    flops = 2 * n_rows * (input_dim * h1 + h1 * h2 + h2 * h3 + h3 * c_pad)
    transcendentals = n_rows * (c_pad + 1)           # exp + reciprocal
    bytes_accessed = (n_rows * input_dim * x.dtype.itemsize
                      + w_elems * cd.itemsize + b_elems * 4
                      + n_rows * c_pad * od.itemsize)
    cost = pl.CostEstimate(flops=flops, transcendentals=transcendentals,
                           bytes_accessed=bytes_accessed)

    kernel = functools.partial(_mlp_softmax_kernel, compute_dtype=cd,
                               approx_recip=(cd != jnp.dtype(jnp.float32)))

    # NOTE: the 8 constant weight/bias specs could carry pipeline_mode=pl.Buffered(1)
    # to drop their second VMEM buffer on v7x, but the whole parameter set is < 30 KiB
    # here so it is intentionally omitted.
    out_padded = pl.pallas_call(
        kernel,
        out_shape=jax.ShapeDtypeStruct((B, c_pad), od),
        grid_spec=pltpu.PrefetchScalarGridSpec(
            num_scalar_prefetch=0,
            grid=(grid,),
            in_specs=[
                # x: tiled over batch -> double-buffered DMA overlapping compute.
                pl.BlockSpec((tile_b, input_dim), lambda i: (i, 0)),
                # weights/biases: full blocks, constant index_map -> VMEM-resident.
                pl.BlockSpec((input_dim, h1), lambda i: (0, 0)),
                pl.BlockSpec((1, h1), lambda i: (0, 0)),
                pl.BlockSpec((h1, h2), lambda i: (0, 0)),
                pl.BlockSpec((1, h2), lambda i: (0, 0)),
                pl.BlockSpec((h2, h3), lambda i: (0, 0)),
                pl.BlockSpec((1, h3), lambda i: (0, 0)),
                pl.BlockSpec((h3, c_pad), lambda i: (0, 0)),
                pl.BlockSpec((1, c_pad), lambda i: (0, 0)),
            ],
            out_specs=pl.BlockSpec((tile_b, c_pad), lambda i: (i, 0)),
        ),
        compiler_params=pltpu.CompilerParams(
            dimension_semantics=("parallel",),       # shard the batch grid over TCs
            vmem_limit_bytes=vmem_limit),
        cost_estimate=cost,
    )(x, w1, b1, w2, b2, w3, b3, w4, b4)

    return out_padded[:, :num_classes]


def init_params(key, input_dim, num_classes=4):
    """Deterministic init mimicking PyTorch Linear default (U(-1/sqrt(fan_in), +))."""
    dims = [(input_dim, 128), (128, 64), (64, 32), (32, num_classes)]
    params = {}
    for i, (fan_in, fan_out) in enumerate(dims, start=1):
        key, kw, kb = jax.random.split(key, 3)
        bound = 1.0 / jnp.sqrt(float(fan_in))
        # Weights stored [in, out] so the kernel does x @ W (transpose of torch layout).
        params[f"w{i}"] = jax.random.uniform(
            kw, (fan_in, fan_out), jnp.float32, -bound, bound)
        # Biases as [1, out] rows (2-D keeps TPU vector layout happy; broadcasts over B).
        params[f"b{i}"] = jax.random.uniform(
            kb, (1, fan_out), jnp.float32, -bound, bound)
    return params


def _reference_forward(x, params, compute_dtype=jnp.float32):
    """Plain-JAX reference mirroring the kernel's matmul dtype (f32 accumulation)."""
    cd = jnp.dtype(compute_dtype)

    def dense(h, w, b):
        return jnp.dot(h.astype(cd), w.astype(cd),
                       preferred_element_type=jnp.float32) + b

    h = jnp.maximum(dense(x, params["w1"], params["b1"]), 0.0)
    h = jnp.maximum(dense(h, params["w2"], params["b2"]), 0.0)
    h = jnp.maximum(dense(h, params["w3"], params["b3"]), 0.0)
    logits = dense(h, params["w4"], params["b4"])
    return jax.nn.softmax(logits, axis=1)


if __name__ == "__main__":
    key = jax.random.PRNGKey(0)
    key, kx, kp, kx2 = jax.random.split(key, 4)

    B, INPUT_DIM, NUM_CLASSES = 8, 32, 4
    x = jax.random.normal(kx, (B, INPUT_DIM), dtype=jnp.float32)
    params = init_params(kp, INPUT_DIM, NUM_CLASSES)

    # ---- f32 matmul path (exact reciprocal): tight check vs plain-JAX reference ----
    out_f32 = jax.block_until_ready(
        my_clf_forward(x, params, compute_dtype=jnp.float32))
    ref_f32 = _reference_forward(x, params, jnp.float32)
    assert out_f32.shape == (B, NUM_CLASSES)
    assert out_f32.dtype == jnp.float32
    assert jnp.allclose(out_f32, ref_f32, atol=1e-5, rtol=1e-5)
    assert jnp.allclose(jnp.sum(out_f32, axis=1), 1.0, atol=1e-5)

    # ---- bf16 matmul path (approx reciprocal on the EUP) ----
    out_bf16 = jax.block_until_ready(
        my_clf_forward(x, params, compute_dtype=jnp.bfloat16))
    ref_bf16 = _reference_forward(x, params, jnp.bfloat16)
    assert out_bf16.shape == (B, NUM_CLASSES)
    assert jnp.allclose(out_bf16, ref_bf16, atol=1e-2, rtol=1e-2)
    assert jnp.allclose(out_bf16, ref_f32, atol=5e-2)
    assert jnp.allclose(jnp.sum(out_bf16, axis=1), 1.0, atol=2e-3)

    # ---- large ragged batch: bf16 input, bf16 writeback, >=2 parallel grid steps,
    #      no wrapper-side batch padding (B=1000 is not a multiple of the tile) ----
    B2 = 1000
    x2 = jax.random.normal(kx2, (B2, INPUT_DIM), dtype=jnp.float32)
    out2 = jax.block_until_ready(
        my_clf_forward(x2.astype(jnp.bfloat16), params,
                       compute_dtype=jnp.bfloat16, out_dtype=jnp.bfloat16))
    ref2 = _reference_forward(x2, params, jnp.bfloat16)
    assert out2.shape == (B2, NUM_CLASSES)
    assert out2.dtype == jnp.bfloat16
    assert jnp.allclose(out2.astype(jnp.float32), ref2, atol=1.5e-2, rtol=1e-2)
    assert jnp.allclose(jnp.sum(out2.astype(jnp.float32), axis=1), 1.0, atol=2e-2)

    print("KERNEL_OK")
</pallas_src>

<mosaic_0001>
module attributes {stable_mosaic.version = 11 : i64} {
  func.func @_mlp_softmax_kernel(%arg0: i32, %arg1: memref<8x32xf32, #tpu.memory_space<vmem>>, %arg2: memref<32x128xf32, #tpu.memory_space<vmem>>, %arg3: memref<1x128xf32, #tpu.memory_space<vmem>>, %arg4: memref<128x64xf32, #tpu.memory_space<vmem>>, %arg5: memref<1x64xf32, #tpu.memory_space<vmem>>, %arg6: memref<64x32xf32, #tpu.memory_space<vmem>>, %arg7: memref<1x32xf32, #tpu.memory_space<vmem>>, %arg8: memref<32x128xf32, #tpu.memory_space<vmem>>, %arg9: memref<1x128xf32, #tpu.memory_space<vmem>>, %arg10: memref<8x128xf32, #tpu.memory_space<vmem>>) attributes {dimension_semantics = [#tpu.dimension_semantics<parallel>], iteration_bounds = array<i64: 1>, scalar_prefetch = 0 : i64, scratch_operands = 0 : i64, tpu.core_type = #tpu.core_type<tc>, window_params = [{transform_indices = @transform_0, window_bounds = array<i64: 8, 32>}, {pipeline_mode = #tpu.pipeline_mode<synchronous>, transform_indices = @transform_1, window_bounds = array<i64: 32, 128>}, {pipeline_mode = #tpu.pipeline_mode<synchronous>, transform_indices = @transform_2, window_bounds = array<i64: 1, 128>}, {pipeline_mode = #tpu.pipeline_mode<synchronous>, transform_indices = @transform_3, window_bounds = array<i64: 128, 64>}, {pipeline_mode = #tpu.pipeline_mode<synchronous>, transform_indices = @transform_4, window_bounds = array<i64: 1, 64>}, {pipeline_mode = #tpu.pipeline_mode<synchronous>, transform_indices = @transform_5, window_bounds = array<i64: 64, 32>}, {pipeline_mode = #tpu.pipeline_mode<synchronous>, transform_indices = @transform_6, window_bounds = array<i64: 1, 32>}, {pipeline_mode = #tpu.pipeline_mode<synchronous>, transform_indices = @transform_7, window_bounds = array<i64: 32, 128>}, {pipeline_mode = #tpu.pipeline_mode<synchronous>, transform_indices = @transform_8, window_bounds = array<i64: 1, 128>}, {transform_indices = @transform_9, window_bounds = array<i64: 8, 128>}]} {
    %c0 = arith.constant 0 : index
    %c0_0 = arith.constant 0 : index
    %0 = vector.load %arg1[%c0, %c0_0] : memref<8x32xf32, #tpu.memory_space<vmem>>, vector<8x32xf32>
    %c0_1 = arith.constant 0 : index
    %c0_2 = arith.constant 0 : index
    %1 = vector.load %arg2[%c0_1, %c0_2] : memref<32x128xf32, #tpu.memory_space<vmem>>, vector<32x128xf32>
    %cst = arith.constant dense<0.000000e+00> : vector<8x128xf32>
    %2 = tpu.matmul %0, %1, %cst {dimension_numbers = #tpu.dot_dimension_numbers<[1], [0], [0], [1], [0, 0, 1, 1], [], []>} : vector<8x32xf32>, vector<32x128xf32>, vector<8x128xf32> -> vector<8x128xf32>
    %c0_3 = arith.constant 0 : index
    %c0_4 = arith.constant 0 : index
    %3 = vector.load %arg3[%c0_3, %c0_4] : memref<1x128xf32, #tpu.memory_space<vmem>>, vector<1x128xf32>
    %4 = vector.broadcast %3 : vector<1x128xf32> to vector<8x128xf32>
    %5 = arith.addf %2, %4 : vector<8x128xf32>
    %cst_5 = arith.constant 0.000000e+00 : f32
    %6 = vector.broadcast %cst_5 : f32 to vector<8x128xf32>
    %7 = arith.maximumf %5, %6 : vector<8x128xf32>
    %c0_6 = arith.constant 0 : index
    %c0_7 = arith.constant 0 : index
    %8 = vector.load %arg4[%c0_6, %c0_7] : memref<128x64xf32, #tpu.memory_space<vmem>>, vector<128x64xf32>
    %cst_8 = arith.constant dense<0.000000e+00> : vector<8x64xf32>
    %9 = tpu.matmul %7, %8, %cst_8 {dimension_numbers = #tpu.dot_dimension_numbers<[1], [0], [0], [1], [0, 0, 1, 1], [], []>} : vector<8x128xf32>, vector<128x64xf32>, vector<8x64xf32> -> vector<8x64xf32>
    %c0_9 = arith.constant 0 : index
    %c0_10 = arith.constant 0 : index
    %10 = vector.load %arg5[%c0_9, %c0_10] : memref<1x64xf32, #tpu.memory_space<vmem>>, vector<1x64xf32>
    %11 = vector.broadcast %10 : vector<1x64xf32> to vector<8x64xf32>
    %12 = arith.addf %9, %11 : vector<8x64xf32>
    %cst_11 = arith.constant 0.000000e+00 : f32
    %13 = vector.broadcast %cst_11 : f32 to vector<8x64xf32>
    %14 = arith.maximumf %12, %13 : vector<8x64xf32>
    %c0_12 = arith.constant 0 : index
    %c0_13 = arith.constant 0 : index
    %15 = vector.load %arg6[%c0_12, %c0_13] : memref<64x32xf32, #tpu.memory_space<vmem>>, vector<64x32xf32>
    %cst_14 = arith.constant dense<0.000000e+00> : vector<8x32xf32>
    %16 = tpu.matmul %14, %15, %cst_14 {dimension_numbers = #tpu.dot_dimension_numbers<[1], [0], [0], [1], [0, 0, 1, 1], [], []>} : vector<8x64xf32>, vector<64x32xf32>, vector<8x32xf32> -> vector<8x32xf32>
    %c0_15 = arith.constant 0 : index
    %c0_16 = arith.constant 0 : index
    %17 = vector.load %arg7[%c0_15, %c0_16] : memref<1x32xf32, #tpu.memory_space<vmem>>, vector<1x32xf32>
    %18 = vector.broadcast %17 : vector<1x32xf32> to vector<8x32xf32>
    %19 = arith.addf %16, %18 : vector<8x32xf32>
    %cst_17 = arith.constant 0.000000e+00 : f32
    %20 = vector.broadcast %cst_17 : f32 to vector<8x32xf32>
    %21 = arith.maximumf %19, %20 : vector<8x32xf32>
    %c0_18 = arith.constant 0 : index
    %c0_19 = arith.constant 0 : index
    %22 = vector.load %arg8[%c0_18, %c0_19] : memref<32x128xf32, #tpu.memory_space<vmem>>, vector<32x128xf32>
    %cst_20 = arith.constant dense<0.000000e+00> : vector<8x128xf32>
    %23 = tpu.matmul %21, %22, %cst_20 {dimension_numbers = #tpu.dot_dimension_numbers<[1], [0], [0], [1], [0, 0, 1, 1], [], []>} : vector<8x32xf32>, vector<32x128xf32>, vector<8x128xf32> -> vector<8x128xf32>
    %c0_21 = arith.constant 0 : index
    %c0_22 = arith.constant 0 : index
    %24 = vector.load %arg9[%c0_21, %c0_22] : memref<1x128xf32, #tpu.memory_space<vmem>>, vector<1x128xf32>
    %25 = vector.broadcast %24 : vector<1x128xf32> to vector<8x128xf32>
    %26 = arith.addf %23, %25 : vector<8x128xf32>
    %cst_23 = arith.constant dense<0xFF800000> : vector<8xf32>
    %27 = vector.multi_reduction <maximumf>, %26, %cst_23 [1] : vector<8x128xf32> to vector<8xf32>
    %28 = vector.shape_cast %27 : vector<8xf32> to vector<8x1xf32>
    %29 = vector.broadcast %28 : vector<8x1xf32> to vector<8x128xf32>
    %30 = arith.subf %26, %29 : vector<8x128xf32>
    %31 = math.exp %30 : vector<8x128xf32>
    %cst_24 = arith.constant dense<0.000000e+00> : vector<8xf32>
    %32 = vector.multi_reduction <add>, %31, %cst_24 [1] : vector<8x128xf32> to vector<8xf32>
    %33 = vector.shape_cast %32 : vector<8xf32> to vector<8x1xf32>
    %34 = tpu.reciprocal %33 : vector<8x1xf32> -> vector<8x1xf32>
    %35 = vector.broadcast %34 : vector<8x1xf32> to vector<8x128xf32>
    %36 = arith.mulf %31, %35 : vector<8x128xf32>
    %c0_25 = arith.constant 0 : index
    %c0_26 = arith.constant 0 : index
    %37 = vector.load %arg10[%c0_25, %c0_26] : memref<8x128xf32, #tpu.memory_space<vmem>>, vector<8x128xf32>
    tpu.vector_store %arg10[%c0_25, %c0_26], %36 {strides = array<i32>} : memref<8x128xf32, #tpu.memory_space<vmem>>, vector<8x128xf32>,
    return
  }
  func.func @transform_0(%arg0: i32) -> (i32, i32) {
    %c0_i32 = arith.constant 0 : i32
    %c0_i32_0 = arith.constant 0 : i32
    return %arg0, %c0_i32 : i32, i32
  }
  func.func @transform_1(%arg0: i32) -> (i32, i32) {
    %c0_i32 = arith.constant 0 : i32
    %c0_i32_0 = arith.constant 0 : i32
    %c0_i32_1 = arith.constant 0 : i32
    return %c0_i32, %c0_i32_0 : i32, i32
  }
  func.func @transform_2(%arg0: i32) -> (i32, i32) {
    %c0_i32 = arith.constant 0 : i32
    %c0_i32_0 = arith.constant 0 : i32
    %c0_i32_1 = arith.constant 0 : i32
    return %c0_i32, %c0_i32_0 : i32, i32
  }
  func.func @transform_3(%arg0: i32) -> (i32, i32) {
    %c0_i32 = arith.constant 0 : i32
    %c0_i32_0 = arith.constant 0 : i32
    %c0_i32_1 = arith.constant 0 : i32
    return %c0_i32, %c0_i32_0 : i32, i32
  }
  func.func @transform_4(%arg0: i32) -> (i32, i32) {
    %c0_i32 = arith.constant 0 : i32
    %c0_i32_0 = arith.constant 0 : i32
    %c0_i32_1 = arith.constant 0 : i32
    return %c0_i32, %c0_i32_0 : i32, i32
  }
  func.func @transform_5(%arg0: i32) -> (i32, i32) {
    %c0_i32 = arith.constant 0 : i32
    %c0_i32_0 = arith.constant 0 : i32
    %c0_i32_1 = arith.constant 0 : i32
    return %c0_i32, %c0_i32_0 : i32, i32
  }
  func.func @transform_6(%arg0: i32) -> (i32, i32) {
    %c0_i32 = arith.constant 0 : i32
    %c0_i32_0 = arith.constant 0 : i32
    %c0_i32_1 = arith.constant 0 : i32
    return %c0_i32, %c0_i32_0 : i32, i32
  }
  func.func @transform_7(%arg0: i32) -> (i32, i32) {
    %c0_i32 = arith.constant 0 : i32
    %c0_i32_0 = arith.constant 0 : i32
    %c0_i32_1 = arith.constant 0 : i32
    return %c0_i32, %c0_i32_0 : i32, i32
  }
  func.func @transform_8(%arg0: i32) -> (i32, i32) {
    %c0_i32 = arith.constant 0 : i32
    %c0_i32_0 = arith.constant 0 : i32
    %c0_i32_1 = arith.constant 0 : i32
    return %c0_i32, %c0_i32_0 : i32, i32
  }
  func.func @transform_9(%arg0: i32) -> (i32, i32) {
    %c0_i32 = arith.constant 0 : i32
    %c0_i32_0 = arith.constant 0 : i32
    return %arg0, %c0_i32 : i32, i32
  }
}

</mosaic_0001>

<bundles_post_ra>
// kernel: tpu_custom_call.1
= control target key start
LH: loop header
LB: loop body
LE: loop exit
PB: predicated region body
PF: predicated region fallthrough
CT: control target
= control target key end

     0   :  { %v611_v3 = vmov 0.0|0.0   ;;  %vm612_vm0 = vmmov 0   ;;  %v613_v6 = vmov 0.0   ;;  %s814_s0 = inlined_call_operand.vmem [shape: f32[8,32], index: 0, kind: input, shape index: {}]   ;;  %s815_s1 = inlined_call_operand.vmem [shape: f32[32,128], index: 1, kind: input, shape index: {}]   ;;  %s816_s2 = inlined_call_operand.vmem [shape: f32[1,128], index: 2, kind: input, shape index: {}]   ;;  %s817_s3 = inlined_call_operand.vmem [shape: f32[128,64], index: 3, kind: input, shape index: {}]   ;;  %s818_s4 = inlined_call_operand.vmem [shape: f32[1,64], index: 4, kind: input, shape index: {}]   ;;  %s819_s5 = inlined_call_operand.vmem [shape: f32[64,32], index: 5, kind: input, shape index: {}]   ;;  %s820_s6 = inlined_call_operand.vmem [shape: f32[1,32], index: 6, kind: input, shape index: {}]   ;;  %s821_s7 = inlined_call_operand.vmem [shape: f32[32,128], index: 7, kind: input, shape index: {}]   ;;  %s822_s8 = inlined_call_operand.vmem [shape: f32[1,128], index: 8, kind: input, shape index: {}]   ;;  %s823_s9 = inlined_call_operand.hbm [shape: f32[8,128], index: 9, kind: output, shape index: {}]  }
   0x1   :  { %v34_v0 = vld [vmem:[%s815_s1] sm:$0xff]  ;;  %v35_v1 = vld [vmem:[%s815_s1 + $0x8] sm:$0xff]  ;;  %v36_v2 = vld [vmem:[%s815_s1 + $0x10] sm:$0xff]  ;;  %531 = vmatprep.subr.bf16.mxu0 %v611_v3  ;;  %463 = vmatprep.mubr.msk.f32.mxu0 %vm612_vm0, %v613_v6 }
   0x2   :  { %v532_v4 = vpack.c.bf16 %v35_v1, %v34_v0  ;;  %v37_v5 = vld [vmem:[%s815_s1 + $0x18] sm:$0xff]  ;;  %v120_v7 = vld [vmem:[%s817_s3] sm:$0xff]  ;;  %537 = vmatprep.subr.bf16.mxu1 %v611_v3  ;;  %v121_v8 = vld [vmem:[%s817_s3 + $0x8] sm:$0xff]  ;;  %498 = vmatprep.mubr.msk.f32.mxu1 %vm612_vm0, %v613_v6 }
   0x3   :  { %v122_v9 = vld [vmem:[%s817_s3 + $0x10] sm:$0xff]  ;;  %v123_v10 = vld [vmem:[%s817_s3 + $0x18] sm:$0xff]  ;;  %v535_v11 = vpack.c.bf16 %v37_v5, %v36_v2  ;;  %v538_v12 = vpack.c.bf16 %v121_v8, %v120_v7  ;;  %v124_v14 = vld [vmem:[%s817_s3 + $0x20] sm:$0xff] }
   0x4   :  { %533 = vmatpush3.bf16.msra.mxu0 %v532_v4  ;;  %v541_v13 = vpack.c.bf16 %v123_v10, %v122_v9  ;;  %v125_v15 = vld [vmem:[%s817_s3 + $0x28] sm:$0xff] }
   0x5   :  { %534 = vmatprep.subr.bf16.mxu0 %v611_v3  ;;  %539 = vmatpush3.bf16.msra.mxu1 %v538_v12 }
   0x6   :  { %540 = vmatprep.subr.bf16.mxu1 %v611_v3 }
   0x7   :  { %14 = vsyncpa [#allocation3], 0  ;;  %v33_v16 = vld [vmem:[%s814_s0] sm:$0xff]  ;;  %vm45_vm1 = vcmask 261120   ;;  %v544_v17 = vpack.c.bf16 %v125_v15, %v124_v14  ;;  %v126_v18 = vld [vmem:[%s817_s3 + $0x30] sm:$0xff]  ;;  %vm229_vm2 = vcmask 523264  }
   0x8   :  { %536 = vmatpush3.bf16.msra.mxu0 %v535_v11  ;;  %v127_v19 = vld [vmem:[%s817_s3 + $0x38] sm:$0xff]  ;;  %v128_v21 = vld [vmem:[%s817_s3 + $0x40] sm:$0xff]  ;;  %v129_v22 = vld [vmem:[%s817_s3 + $0x48] sm:$0xff] }
   0x9   :  { %561 = vmatprep.subr.bf16.mxu0 %v611_v3  ;;  %542 = vmatpush3.bf16.msra.mxu1 %v541_v13  ;;  %v547_v20 = vpack.c.bf16 %v127_v19, %v126_v18  ;;  %v550_v23 = vpack.c.bf16 %v129_v22, %v128_v21  ;;  %v130_v24 = vld [vmem:[%s817_s3 + $0x50] sm:$0xff]  ;;  %v131_v25 = vld [vmem:[%s817_s3 + $0x58] sm:$0xff]  ;;  %v132_v27 = vld [vmem:[%s817_s3 + $0x60] sm:$0xff] }
   0xa   :  { %543 = vmatprep.subr.bf16.mxu1 %v611_v3  ;;  %v553_v26 = vpack.c.bf16 %v131_v25, %v130_v24  ;;  %v133_v28 = vld [vmem:[%s817_s3 + $0x68] sm:$0xff]  ;;  %v134_v30 = vld [vmem:[%s817_s3 + $0x70] sm:$0xff]  ;;  %v135_v31 = vld [vmem:[%s817_s3 + $0x78] sm:$0xff] }
   0xb   :  { %464 = vmatmul.mubr.msk.f32.vlgmr.msra.gmra.mrb[0].mxu0 %vm45_vm1, %v33_v16  ;;  %v556_v29 = vpack.c.bf16 %v133_v28, %v132_v27  ;;  %v559_v32 = vpack.c.bf16 %v135_v31, %v134_v30  ;;  %v214_v33 = vld [vmem:[%s819_s5] sm:$0xff]  ;;  %v215_v34 = vld [vmem:[%s819_s5 + $0x8] sm:$0xff]  ;;  %v216_v35 = vld [vmem:[%s819_s5 + $0x10] sm:$0xff] }
   0xc   :  { %517 = vmatprep.mubr.msk.f32.mxu0 %vm612_vm0, %v613_v6  ;;  %v562_v36 = vpack.c.bf16 %v215_v34, %v214_v33  ;;  %v217_v37 = vld [vmem:[%s819_s5 + $0x18] sm:$0xff]  ;;  %v218_v39 = vld [vmem:[%s819_s5 + $0x20] sm:$0xff]  ;;  %v219_v40 = vld [vmem:[%s819_s5 + $0x28] sm:$0xff] }
   0xd   :  { %545 = vmatpush3.bf16.msra.mxu1 %v544_v17  ;;  %v565_v38 = vpack.c.bf16 %v217_v37, %v216_v35  ;;  %v568_v41 = vpack.c.bf16 %v219_v40, %v218_v39  ;;  %v412_v42 = vld [vmem:[%s816_s2] ss:$0 sm:$0xff]  ;;  %v220_v47 = vld [vmem:[%s819_s5 + $0x30] sm:$0xff]  ;;  %v221_v48 = vld [vmem:[%s819_s5 + $0x38] sm:$0xff] }
   0xe   :  { %546 = vmatprep.subr.bf16.mxu1 %v611_v3  ;;  %563 = vmatpush3.bf16.msra.mxu0 %v562_v36  ;;  %v571_v49 = vpack.c.bf16 %v221_v48, %v220_v47  ;;  %v414_v50 = vld [vmem:[%s818_s4] ss:$0 sm:$0xff]  ;;  %v305_v52 = vld [vmem:[%s821_s7 + $0x8] sm:$0xff]  ;;  %v306_v58 = vld [vmem:[%s821_s7 + $0x10] sm:$0xff] }
   0xf   :  { %564 = vmatprep.subr.bf16.mxu0 %v611_v3  ;;  %v304_v51 = vld [vmem:[%s821_s7] sm:$0xff]  ;;  %v307_v59 = vld [vmem:[%s821_s7 + $0x18] sm:$0xff] }
  0x10   :  { %v574_v56 = vpack.c.bf16 %v305_v52, %v304_v51  ;;  %v577_v60 = vpack.c.bf16 %v307_v59, %v306_v58  ;;  %v415_v61 = vld [vmem:[%s820_s6] ss:$0 sm:$0xff]  ;;  %s614_s6 = smov [#allocation2]  }
  0x11   :  { %548 = vmatpush3.bf16.msra.mxu1 %v547_v20  ;;  %v417_v2 = vld [vmem:[%s822_s8] ss:$0 sm:$0xff]  ;;  %s404_s7 = sshll.u32 %s614_s6, 4  ;;  %s405_s7 = int_to_ptr.vmem [resolvable:$true] %s404_s7 }
  0x12   :  { %549 = vmatprep.subr.bf16.mxu1 %v611_v3  ;;  %566 = vmatpush3.bf16.msra.mxu0 %v565_v38  ;;  %s587_s11 = scalar_lea.vmem %s405_s7, 128  ;;  %p592_p1 = scmp.lt.s32.totalorder %s405_s7, %s405_s7 }
  0x13   :  { %567 = vmatprep.subr.bf16.mxu0 %v611_v3  ;;  %p588_p0 = scmp.ne.s32.totalorder %s405_s7, %s587_s11  ;;  %p593_p2 = scmp.lt.s32.totalorder %s587_s11, %s587_s11 }
  0x15   :  { %551 = vmatpush3.bf16.msra.mxu1 %v550_v23  ;;  %p594_p3 = por %p593_p2, %p592_p1 }
  0x16   :  { %552 = vmatprep.subr.bf16.mxu1 %v611_v3  ;;  %569 = vmatpush3.bf16.msra.mxu0 %v568_v41 }
  0x17   :  { %570 = vmatprep.subr.bf16.mxu0 %v611_v3  ;;  %p595_p4 = pnand %p594_p3, %p588_p0 }
  0x19   :  { %554 = vmatpush3.bf16.msra.mxu1 %v553_v26 }
  0x1a   :  { %555 = vmatprep.subr.bf16.mxu1 %v611_v3  ;;  %572 = vmatpush3.bf16.msra.mxu0 %v571_v49 }
  0x1b   :  { %573 = vmatprep.subr.bf16.mxu0 %v611_v3 }
  0x1d   :  { %557 = vmatpush3.bf16.msra.mxu1 %v556_v29 }
  0x1e   :  { %558 = vmatprep.subr.bf16.mxu1 %v611_v3 }
  0x21   :  { %560 = vmatpush3.bf16.msra.mxu1 %v559_v32 }
  0xde   :  { %v115_v43 = vpop.f32.mrb[0].mxu0 }
  0xdf   :  { %v116_v44 = vadd.f32 %v412_v42, %v115_v43  ;;  %v465_v45 = vpop.f32.mrb[1].mxu0 }
  0xe1   :  { %v119_v46 = vmax.f32 %v116_v44, 0.0 }
  0xe3   :  { %499 = vmatmul.mubr.f32.vlgmr.msra.gmra.mrb[0].mxu1 %v119_v46 }
 0x1b6   :  { %v209_v53 = vpop.f32.mrb[0].mxu1 }
 0x1b7   :  { %v210_v54 = vadd.f32 %v414_v50, %v209_v53  ;;  %v500_v55 = vpop.f32.mrb[1].mxu1 }
 0x1b9   :  { %v213_v57 = vmax.f32 %v210_v54, 0.0 }
 0x1bb   :  { %518 = vmatmul.mubr.msk.f32.vlgmr.msra.gmra.mrb[2].mxu0 %vm229_vm2, %v213_v57 }
 0x1bc   :  { %575 = vmatpush3.bf16.msra.mxu0 %v574_v56  ;;  %528 = vmatprep.mubr.msk.f32.mxu0 %vm612_vm0, %v613_v6 }
 0x1bd   :  { %576 = vmatprep.subr.bf16.mxu0 %v611_v3 }
 0x1c0   :  { %578 = vmatpush3.bf16.msra.mxu0 %v577_v60 }
 0x28e   :  { %v299_v62 = vpop.f32.mrb[2].mxu0 }
 0x28f   :  { %v300_v63 = vadd.f32 %v415_v61, %v299_v62  ;;  %v519_v0 = vpop.f32.mrb[3].mxu0 }
 0x291   :  { %v303_v1 = vmax.f32 %v300_v63, 0.0 }
 0x293   :  { %529 = vmatmul.mubr.msk.f32.vlgmr.msra.gmra.mrb[4].mxu0 %vm45_vm1, %v303_v1 }
 0x366   :  { %v384_v3 = vpop.f32.mrb[4].mxu0 }
 0x367   :  { %v385_v4 = vadd.f32 %v417_v2, %v384_v3  ;;  %v530_v5 = vpop.f32.mrb[5].mxu0 }
 0x369   :  { %388 = vmax.xlane.f32.xlu0 %v385_v4 }
 0x3f6   :  { %v389_v6 = vpop.xlane.xlu0 %388 }
 0x3f7   :  { %v390_v7 = vsub.f32 %v385_v4, %v389_v6 }
 0x3f9   :  { %v391_v8 = vmul.f32 1.442695, %v390_v7 }
 0x3fb   :  { %583 = vpow2.f32 %v391_v8 }
 0x405   :  { %v584_v9 = vpop.eup %583 }
 0x406   :  { %393 = vadd.xlane.f32.xlu0 %v584_v9 }
 0x493   :  { %v394_v10 = vpop.xlane.xlu0 %393 }
 0x494   :  { %585 = vrcp.f32 %v394_v10 }
 0x49e   :  { %v586_v11 = vpop.eup %585 }
 0x49f   :  { %v396_v12 = vmul.f32 %v586_v11, %v584_v9 }
 0x4a1   :  { %397 = vst [vmem:[#allocation2] sm:$0xff] %v396_v12 }
 0x4a2   :  { %598 = shalt.err (!%p595_p4)
}
 0x4a3   :  { %s599_s0 = scalar_lea.hbm %s823_s9, 128 }
 0x4a4   :  { %p600_p5 = scmp.ne.s32.totalorder %s823_s9, %s599_s0  ;;  %p603_p6 = scmp.lt.u32.totalorder %s599_s0, %s823_s9 }
 0x4a6   :  { %p605_p7 = pnand %p603_p6, %p600_p5 }
 0x4a8   :  { %608 = shalt.err (!%p605_p7)
}
 0x4a9   :  { %407 = dma.vmem_to_hbm [thread:$0]  %s405_s7, 128, %s823_s9, [#allocation3]  }
 0x4aa   :  { %609 = dma.done.wait [#allocation3], 128  }
 0x4ab   :  { %610 = vsyncadd [#allocation3], 4294967168 }
 0x4ac   :  { %411 = vsyncpa [#allocation3], 1 }

</bundles_post_ra>
